<compile_context>
chip_gen: v7x
topology: tpu7x:2x2x1
jax: 0.10.0
libtpu: 0.0.40
codegen_flags: <defaults>
</compile_context>

<pallas_src>
import functools

import jax
import jax.numpy as jnp
from jax.experimental import pallas as pl
from jax.experimental.pallas import tpu as pltpu


LANE = 128      # lane quantum (last dim)
SUBLANE = 8     # f32 sublane quantum (second-to-last dim)


def _round_up(x, m):
    return (x + m - 1) // m * m


# ----------------------------------------------------------------------------
# Parameter init (deterministic, mirrors orthogonal_init: orthogonal weights
# with gain=1.414, zero biases).  Weights are stored transposed vs. PyTorch
# ([in, out]) and zero-padded on both dims up to a multiple of 128, in bf16.
# Biases are [1, out_padded] f32.  Plain-JAX glue, not part of the hot path.
# ----------------------------------------------------------------------------
def _orthogonal(key, out_dim, in_dim, gain=1.414):
    # Same spirit as torch.nn.init.orthogonal_ on a (out, in) weight.
    rows, cols = out_dim, in_dim
    n, m = (rows, cols) if rows >= cols else (cols, rows)
    a = jax.random.normal(key, (n, m), dtype=jnp.float32)
    q, r = jnp.linalg.qr(a)
    d = jnp.sign(jnp.diagonal(r))
    q = q * d[None, :]
    w = q if rows >= cols else q.T          # (out, in)
    return (gain * w).T                     # stored as (in, out), f32


def init_qnet_params(key, state_dim, action_dim, hid_shape,
                     w_dtype=jnp.bfloat16):
    layer_shape = [state_dim] + list(hid_shape) + [action_dim]
    params = []
    for j in range(len(layer_shape) - 1):
        key, sub = jax.random.split(key)
        in_d, out_d = layer_shape[j], layer_shape[j + 1]
        in_p, out_p = _round_up(in_d, LANE), _round_up(out_d, LANE)
        w = _orthogonal(sub, out_d, in_d, gain=1.414)             # (in, out)
        w_pad = jnp.zeros((in_p, out_p), jnp.float32).at[:in_d, :out_d].set(w)
        b_pad = jnp.zeros((1, out_p), jnp.float32)                # zero bias
        params.append((w_pad.astype(w_dtype), b_pad))
    return params


# ----------------------------------------------------------------------------
# Pallas kernel: fused MLP forward on one batch tile.  Weights/biases are
# VMEM-resident (constant index_map); activations are lane-dense (padded to
# 128).  Matmuls run bf16 x bf16 -> f32 on the MXU; bias/ReLU in f32.
# ----------------------------------------------------------------------------
def _qnet_kernel(num_layers, *refs):
    # refs = (s_ref, w0, b0, w1, b1, ..., w_{L-1}, b_{L-1}, q_ref)
    s_ref = refs[0]
    q_ref = refs[-1]
    param_refs = refs[1:-1]

    h = s_ref[...]                                   # (TB, D0_pad) f32
    for j in range(num_layers):
        w = param_refs[2 * j][...]                   # (Din_pad, Dout_pad) bf16
        b = param_refs[2 * j + 1][...]               # (1, Dout_pad) f32
        y = jnp.dot(h.astype(w.dtype), w,
                    preferred_element_type=jnp.float32) + b
        h = jnp.maximum(y, 0.0) if j < num_layers - 1 else y
    q_ref[...] = h.astype(q_ref.dtype)


def qnet_forward(s, params, action_dim, *, max_batch_tile=512):
    """Fused Q_Net forward: q = MLP(s).

    s: [batch, state_dim] float32 (unpadded).  Returns [batch, action_dim].
    """
    num_layers = len(params)
    batch, state_dim = s.shape
    in_pad = params[0][0].shape[0]
    out_pad = params[-1][0].shape[1]

    # Pad the feature axis to the lane-dense width and the batch axis to the
    # sublane quantum / batch tile.
    pb = _round_up(batch, SUBLANE)
    tb = min(max_batch_tile, pb)
    pb = _round_up(pb, tb)
    s_pad = jnp.zeros((pb, in_pad), s.dtype).at[:batch, :state_dim].set(s)

    flat_params = []
    for (w, b) in params:
        flat_params += [w, b]

    in_specs = [pl.BlockSpec((tb, in_pad), lambda i: (i, 0))]
    for (w, b) in params:
        in_specs.append(pl.BlockSpec(w.shape, lambda i: (0, 0)))  # resident
        in_specs.append(pl.BlockSpec(b.shape, lambda i: (0, 0)))  # resident
    out_spec = pl.BlockSpec((tb, out_pad), lambda i: (i, 0))

    kernel = functools.partial(_qnet_kernel, num_layers)

    q_pad = pl.pallas_call(
        kernel,
        out_shape=jax.ShapeDtypeStruct((pb, out_pad), s.dtype),
        grid=(pb // tb,),
        in_specs=in_specs,
        out_specs=out_spec,
        compiler_params=pltpu.CompilerParams(
            dimension_semantics=("parallel",),
            vmem_limit_bytes=32 * 1024 * 1024,
        ),
    )(s_pad, *flat_params)

    return q_pad[:batch, :action_dim]


# ----------------------------------------------------------------------------
# Pure-JAX reference for correctness check (same bf16-weight / f32-acc math).
# ----------------------------------------------------------------------------
def qnet_ref(s, params, action_dim):
    batch, state_dim = s.shape
    in_pad = params[0][0].shape[0]
    h = jnp.zeros((batch, in_pad), jnp.float32).at[:, :state_dim].set(s)
    for j, (w, b) in enumerate(params):
        y = jnp.dot(h.astype(jnp.bfloat16).astype(jnp.float32),
                    w.astype(jnp.float32),
                    preferred_element_type=jnp.float32) + b
        h = jnp.maximum(y, 0.0) if j < len(params) - 1 else y
    return h[:, :action_dim]


if __name__ == "__main__":
    key = jax.random.PRNGKey(0)

    # Small shapes consistent with Q_Net(state_dim, action_dim, hid_shape)
    state_dim, action_dim = 16, 8
    hid_shape = (32, 32)
    batch = 8

    k_param, k_s = jax.random.split(key)
    params = init_qnet_params(k_param, state_dim, action_dim, hid_shape)
    s = jax.random.normal(k_s, (batch, state_dim), dtype=jnp.float32)

    q = qnet_forward(s, params, action_dim)
    q = jax.block_until_ready(q)

    q_expected = qnet_ref(s, params, action_dim)
    assert q.shape == (batch, action_dim)
    assert jnp.allclose(q, q_expected, atol=2e-3, rtol=2e-3), "mismatch vs reference"

    print("KERNEL_OK")
</pallas_src>

<mosaic_0001>
module attributes {stable_mosaic.version = 11 : i64} {
  func.func @_qnet_kernel(%arg0: i32, %arg1: memref<8x128xf32, #tpu.memory_space<vmem>>, %arg2: memref<128x128xbf16, #tpu.memory_space<vmem>>, %arg3: memref<1x128xf32, #tpu.memory_space<vmem>>, %arg4: memref<128x128xbf16, #tpu.memory_space<vmem>>, %arg5: memref<1x128xf32, #tpu.memory_space<vmem>>, %arg6: memref<128x128xbf16, #tpu.memory_space<vmem>>, %arg7: memref<1x128xf32, #tpu.memory_space<vmem>>, %arg8: memref<8x128xf32, #tpu.memory_space<vmem>>) attributes {dimension_semantics = [#tpu.dimension_semantics<parallel>], iteration_bounds = array<i64: 1>, scalar_prefetch = 0 : i64, scratch_operands = 0 : i64, tpu.core_type = #tpu.core_type<tc>, window_params = [{transform_indices = @transform_0, window_bounds = array<i64: 8, 128>}, {pipeline_mode = #tpu.pipeline_mode<synchronous>, transform_indices = @transform_1, window_bounds = array<i64: 128, 128>}, {pipeline_mode = #tpu.pipeline_mode<synchronous>, transform_indices = @transform_2, window_bounds = array<i64: 1, 128>}, {pipeline_mode = #tpu.pipeline_mode<synchronous>, transform_indices = @transform_3, window_bounds = array<i64: 128, 128>}, {pipeline_mode = #tpu.pipeline_mode<synchronous>, transform_indices = @transform_4, window_bounds = array<i64: 1, 128>}, {pipeline_mode = #tpu.pipeline_mode<synchronous>, transform_indices = @transform_5, window_bounds = array<i64: 128, 128>}, {pipeline_mode = #tpu.pipeline_mode<synchronous>, transform_indices = @transform_6, window_bounds = array<i64: 1, 128>}, {transform_indices = @transform_7, window_bounds = array<i64: 8, 128>}]} {
    %c0 = arith.constant 0 : index
    %c0_0 = arith.constant 0 : index
    %0 = vector.load %arg1[%c0, %c0_0] : memref<8x128xf32, #tpu.memory_space<vmem>>, vector<8x128xf32>
    %c0_1 = arith.constant 0 : index
    %c0_2 = arith.constant 0 : index
    %1 = vector.load %arg2[%c0_1, %c0_2] : memref<128x128xbf16, #tpu.memory_space<vmem>>, vector<128x128xbf16>
    %c0_3 = arith.constant 0 : index
    %c0_4 = arith.constant 0 : index
    %2 = vector.load %arg3[%c0_3, %c0_4] : memref<1x128xf32, #tpu.memory_space<vmem>>, vector<1x128xf32>
    %3 = arith.truncf %0 : vector<8x128xf32> to vector<8x128xbf16>
    %cst = arith.constant dense<0.000000e+00> : vector<8x128xf32>
    %4 = tpu.matmul %3, %1, %cst {dimension_numbers = #tpu.dot_dimension_numbers<[1], [0], [0], [1], [0, 0, 1, 1], [], []>} : vector<8x128xbf16>, vector<128x128xbf16>, vector<8x128xf32> -> vector<8x128xf32>
    %5 = vector.broadcast %2 : vector<1x128xf32> to vector<8x128xf32>
    %6 = arith.addf %4, %5 : vector<8x128xf32>
    %cst_5 = arith.constant 0.000000e+00 : f32
    %7 = vector.broadcast %cst_5 : f32 to vector<8x128xf32>
    %8 = arith.maximumf %6, %7 : vector<8x128xf32>
    %c0_6 = arith.constant 0 : index
    %c0_7 = arith.constant 0 : index
    %9 = vector.load %arg4[%c0_6, %c0_7] : memref<128x128xbf16, #tpu.memory_space<vmem>>, vector<128x128xbf16>
    %c0_8 = arith.constant 0 : index
    %c0_9 = arith.constant 0 : index
    %10 = vector.load %arg5[%c0_8, %c0_9] : memref<1x128xf32, #tpu.memory_space<vmem>>, vector<1x128xf32>
    %11 = arith.truncf %8 : vector<8x128xf32> to vector<8x128xbf16>
    %cst_10 = arith.constant dense<0.000000e+00> : vector<8x128xf32>
    %12 = tpu.matmul %11, %9, %cst_10 {dimension_numbers = #tpu.dot_dimension_numbers<[1], [0], [0], [1], [0, 0, 1, 1], [], []>} : vector<8x128xbf16>, vector<128x128xbf16>, vector<8x128xf32> -> vector<8x128xf32>
    %13 = vector.broadcast %10 : vector<1x128xf32> to vector<8x128xf32>
    %14 = arith.addf %12, %13 : vector<8x128xf32>
    %cst_11 = arith.constant 0.000000e+00 : f32
    %15 = vector.broadcast %cst_11 : f32 to vector<8x128xf32>
    %16 = arith.maximumf %14, %15 : vector<8x128xf32>
    %c0_12 = arith.constant 0 : index
    %c0_13 = arith.constant 0 : index
    %17 = vector.load %arg6[%c0_12, %c0_13] : memref<128x128xbf16, #tpu.memory_space<vmem>>, vector<128x128xbf16>
    %c0_14 = arith.constant 0 : index
    %c0_15 = arith.constant 0 : index
    %18 = vector.load %arg7[%c0_14, %c0_15] : memref<1x128xf32, #tpu.memory_space<vmem>>, vector<1x128xf32>
    %19 = arith.truncf %16 : vector<8x128xf32> to vector<8x128xbf16>
    %cst_16 = arith.constant dense<0.000000e+00> : vector<8x128xf32>
    %20 = tpu.matmul %19, %17, %cst_16 {dimension_numbers = #tpu.dot_dimension_numbers<[1], [0], [0], [1], [0, 0, 1, 1], [], []>} : vector<8x128xbf16>, vector<128x128xbf16>, vector<8x128xf32> -> vector<8x128xf32>
    %21 = vector.broadcast %18 : vector<1x128xf32> to vector<8x128xf32>
    %22 = arith.addf %20, %21 : vector<8x128xf32>
    %c0_17 = arith.constant 0 : index
    %c0_18 = arith.constant 0 : index
    %23 = vector.load %arg8[%c0_17, %c0_18] : memref<8x128xf32, #tpu.memory_space<vmem>>, vector<8x128xf32>
    tpu.vector_store %arg8[%c0_17, %c0_18], %22 {strides = array<i32>} : memref<8x128xf32, #tpu.memory_space<vmem>>, vector<8x128xf32>,
    return
  }
  func.func @transform_0(%arg0: i32) -> (i32, i32) {
    %c0_i32 = arith.constant 0 : i32
    %c0_i32_0 = arith.constant 0 : i32
    return %arg0, %c0_i32 : i32, i32
  }
  func.func @transform_1(%arg0: i32) -> (i32, i32) {
    %c0_i32 = arith.constant 0 : i32
    %c0_i32_0 = arith.constant 0 : i32
    %c0_i32_1 = arith.constant 0 : i32
    return %c0_i32, %c0_i32_0 : i32, i32
  }
  func.func @transform_2(%arg0: i32) -> (i32, i32) {
    %c0_i32 = arith.constant 0 : i32
    %c0_i32_0 = arith.constant 0 : i32
    %c0_i32_1 = arith.constant 0 : i32
    return %c0_i32, %c0_i32_0 : i32, i32
  }
  func.func @transform_3(%arg0: i32) -> (i32, i32) {
    %c0_i32 = arith.constant 0 : i32
    %c0_i32_0 = arith.constant 0 : i32
    %c0_i32_1 = arith.constant 0 : i32
    return %c0_i32, %c0_i32_0 : i32, i32
  }
  func.func @transform_4(%arg0: i32) -> (i32, i32) {
    %c0_i32 = arith.constant 0 : i32
    %c0_i32_0 = arith.constant 0 : i32
    %c0_i32_1 = arith.constant 0 : i32
    return %c0_i32, %c0_i32_0 : i32, i32
  }
  func.func @transform_5(%arg0: i32) -> (i32, i32) {
    %c0_i32 = arith.constant 0 : i32
    %c0_i32_0 = arith.constant 0 : i32
    %c0_i32_1 = arith.constant 0 : i32
    return %c0_i32, %c0_i32_0 : i32, i32
  }
  func.func @transform_6(%arg0: i32) -> (i32, i32) {
    %c0_i32 = arith.constant 0 : i32
    %c0_i32_0 = arith.constant 0 : i32
    %c0_i32_1 = arith.constant 0 : i32
    return %c0_i32, %c0_i32_0 : i32, i32
  }
  func.func @transform_7(%arg0: i32) -> (i32, i32) {
    %c0_i32 = arith.constant 0 : i32
    %c0_i32_0 = arith.constant 0 : i32
    return %arg0, %c0_i32 : i32, i32
  }
}

</mosaic_0001>

<bundles_post_ra>
// kernel: tpu_custom_call.1
= control target key start
LH: loop header
LB: loop body
LE: loop exit
PB: predicated region body
PF: predicated region fallthrough
CT: control target
= control target key end

     0   :  { %12 = vsyncpa [#allocation3], 0  ;;  %s860_s0 = inlined_call_operand.hbm [shape: f32[8,128], index: 0, kind: input, shape index: {}]   ;;  %s861_s1 = inlined_call_operand.hbm [shape: bf16[128,128], index: 1, kind: input, shape index: {}]   ;;  %s862_s2 = inlined_call_operand.vmem [shape: f32[1,128], index: 2, kind: input, shape index: {}]   ;;  %s863_s3 = inlined_call_operand.hbm [shape: bf16[128,128], index: 3, kind: input, shape index: {}]   ;;  %s864_s4 = inlined_call_operand.vmem [shape: f32[1,128], index: 4, kind: input, shape index: {}]   ;;  %s865_s5 = inlined_call_operand.hbm [shape: bf16[128,128], index: 5, kind: input, shape index: {}]   ;;  %s866_s6 = inlined_call_operand.vmem [shape: f32[1,128], index: 6, kind: input, shape index: {}]   ;;  %s867_s7 = inlined_call_operand.hbm [shape: f32[8,128], index: 7, kind: output, shape index: {}]  }
   0x1   :  { %13 = vsyncpa [#allocation6], 0 }
   0x2   :  { %14 = vsyncpa [#allocation9], 0 }
   0x3   :  { %15 = vsyncpa [#allocation4], 0  ;;  %s703_s24 = smov [#allocation5]   ;;  %s585_s28 = scalar_lea.hbm %s861_s1, 1024 }
   0x4   :  { %s31_s25 = sshll.u32 %s703_s24, 4  ;;  %p586_p0 = scmp.ne.s32.totalorder %s861_s1, %s585_s28  ;;  %s32_s25 = int_to_ptr.vmem [resolvable:$true] %s31_s25 }
   0x5   :  { %p589_p1 = scmp.lt.u32.totalorder %s585_s28, %s861_s1 }
   0x7   :  { %p591_p2 = pnand %p589_p1, %p586_p0 }
   0x9   :  { %594 = shalt.err (!%p591_p2)
}
   0xa   :  { %s595_s10 = scalar_lea.vmem %s32_s25, 1024  ;;  %p600_p4 = scmp.lt.s32.totalorder %s32_s25, %s32_s25 }
   0xb   :  { %p596_p3 = scmp.ne.s32.totalorder %s32_s25, %s595_s10  ;;  %p601_p5 = scmp.lt.s32.totalorder %s595_s10, %s595_s10 }
   0xd   :  { %p602_p6 = por %p601_p5, %p600_p4 }
   0xf   :  { %p603_p7 = pnand %p602_p6, %p596_p3 }
  0x11   :  { %606 = shalt.err (!%p603_p7)
}
  0x12   :  { %s704_s11 = smov 64   ;;  %s705_s12 = smov 4  }
  0x13   :  { %37 = dma.hbm_to_vmem [thread:$0]  %s861_s1, 1024, %s32_s25, [#allocation6], %s704_s11, %s704_s11, %s705_s12  }
  0x14   :  { %s706_s15 = smov [#allocation2]   ;;  %s707_s17 = smov [#allocation7]  }
  0x15   :  { %s22_s16 = sshll.u32 %s706_s15, 4  ;;  %s45_s18 = sshll.u32 %s707_s17, 4  ;;  %s23_s16 = int_to_ptr.vmem [resolvable:$true] %s22_s16  ;;  %s46_s18 = int_to_ptr.vmem [resolvable:$true] %s45_s18 }
  0x16   :  { %s607_s21 = scalar_lea.hbm %s860_s0, 128 }
  0x17   :  { %p608_p8 = scmp.ne.s32.totalorder %s860_s0, %s607_s21  ;;  %p611_p9 = scmp.lt.u32.totalorder %s607_s21, %s860_s0 }
  0x19   :  { %p613_p10 = pnand %p611_p9, %p608_p8 }
  0x1b   :  { %616 = shalt.err (!%p613_p10)
}
  0x1c   :  { %s617_s1 = scalar_lea.vmem %s23_s16, 128  ;;  %p622_p12 = scmp.lt.s32.totalorder %s23_s16, %s23_s16 }
  0x1d   :  { %p618_p11 = scmp.ne.s32.totalorder %s23_s16, %s617_s1  ;;  %p623_p13 = scmp.lt.s32.totalorder %s617_s1, %s617_s1 }
  0x1f   :  { %p624_p0 = por %p623_p13, %p622_p12 }
  0x21   :  { %p625_p1 = pnand %p624_p0, %p618_p11 }
  0x23   :  { %628 = shalt.err (!%p625_p1)
}
  0x24   :  { %25 = dma.hbm_to_vmem [thread:$0]  %s860_s0, 128, %s23_s16, [#allocation3]  }
  0x25   :  { %s629_s30 = scalar_lea.hbm %s863_s3, 1024 }
  0x26   :  { %p630_p2 = scmp.ne.s32.totalorder %s863_s3, %s629_s30  ;;  %p633_p3 = scmp.lt.u32.totalorder %s629_s30, %s863_s3 }
  0x28   :  { %p635_p4 = pnand %p633_p3, %p630_p2 }
  0x2a   :  { %638 = shalt.err (!%p635_p4)
}
  0x2b   :  { %s639_s14 = scalar_lea.vmem %s46_s18, 1024  ;;  %p644_p6 = scmp.lt.s32.totalorder %s46_s18, %s46_s18 }
  0x2c   :  { %p640_p5 = scmp.ne.s32.totalorder %s46_s18, %s639_s14  ;;  %p645_p7 = scmp.lt.s32.totalorder %s639_s14, %s639_s14 }
  0x2e   :  { %p646_p8 = por %p645_p7, %p644_p6 }
  0x30   :  { %p647_p9 = pnand %p646_p8, %p640_p5 }
  0x32   :  { %650 = shalt.err (!%p647_p9)
}
  0x33   :  { %51 = dma.hbm_to_vmem [thread:$0]  %s863_s3, 1024, %s46_s18, [#allocation6], %s704_s11, %s704_s11, %s705_s12  }
  0x34   :  { %s708_s16 = smov [#allocation8]   ;;  %s651_s21 = scalar_lea.hbm %s865_s5, 1024 }
  0x35   :  { %s59_s17 = sshll.u32 %s708_s16, 4  ;;  %p652_p10 = scmp.ne.s32.totalorder %s865_s5, %s651_s21  ;;  %s60_s17 = int_to_ptr.vmem [resolvable:$true] %s59_s17 }
  0x36   :  { %p655_p11 = scmp.lt.u32.totalorder %s651_s21, %s865_s5 }
  0x38   :  { %p657_p12 = pnand %p655_p11, %p652_p10 }
  0x3a   :  { %660 = shalt.err (!%p657_p12)
}
  0x3b   :  { %s661_s1 = scalar_lea.vmem %s60_s17, 1024  ;;  %p666_p0 = scmp.lt.s32.totalorder %s60_s17, %s60_s17 }
  0x3c   :  { %p662_p13 = scmp.ne.s32.totalorder %s60_s17, %s661_s1  ;;  %p667_p1 = scmp.lt.s32.totalorder %s661_s1, %s661_s1 }
  0x3e   :  { %p668_p2 = por %p667_p1, %p666_p0 }
  0x40   :  { %p669_p3 = pnand %p668_p2, %p662_p13 }
  0x42   :  { %672 = shalt.err (!%p669_p3)
}
  0x43   :  { %65 = dma.hbm_to_vmem [thread:$0]  %s865_s5, 1024, %s60_s17, [#allocation9], %s704_s11, %s704_s11, %s705_s12  }
  0x44   :  { %695 = dma.done.wait [#allocation3], 128  }
  0x45   :  { %696 = vsyncadd [#allocation3], 4294967168 }
  0x46   :  { %697 = dma.done.wait [#allocation6], 2048  }
  0x47   :  { %698 = vsyncadd [#allocation6], 4294965248 }
  0x48   :  { %699 = dma.done.wait [#allocation9], 1024  }
  0x49   :  { %700 = vsyncadd [#allocation9], 4294966272  ;;  %v709_v0 = vmov 0.0   ;;  %vm710_vm0 = vmmov 0   ;;  %v561_v1 = vld [vmem:[#allocation5] sm:$0xff]   ;;  %v562_v2 = vld [vmem:[#allocation5 + $0x8] sm:$0xff]  }
  0x4a   :  { %492 = vmatprep.subr.bf16.mxu0 %v709_v0  ;;  %508 = vmatprep.mubr.msk.bf16.mxu0 %vm710_vm0, %v709_v0  ;;  %v563_v3 = vld [vmem:[#allocation5 + $0x10] sm:$0xff]   ;;  %v569_v4 = vld [vmem:[#allocation7] sm:$0xff]   ;;  %v564_v5 = vld [vmem:[#allocation5 + $0x18] sm:$0xff]   ;;  %s711_s28 = smov [#allocation10]  }
  0x4b   :  { %512 = vmatprep.subr.bf16.mxu1 %v709_v0  ;;  %528 = vmatprep.mubr.msk.bf16.mxu1 %vm710_vm0, %v709_v0  ;;  %v570_v6 = vld [vmem:[#allocation7 + $0x8] sm:$0xff]   ;;  %v565_v7 = vld [vmem:[#allocation5 + $0x20] sm:$0xff]   ;;  %v571_v8 = vld [vmem:[#allocation7 + $0x10] sm:$0xff]   ;;  %s427_s29 = sshll.u32 %s711_s28, 4  ;;  %s428_s29 = int_to_ptr.vmem [resolvable:$true] %s427_s29 }
  0x4c   :  { %493 = vmatpush3.bf16.msra.mxu0 %v561_v1  ;;  %513 = vmatpush3.bf16.msra.mxu1 %v569_v4  ;;  %v566_v9 = vld [vmem:[#allocation5 + $0x28] sm:$0xff]   ;;  %v572_v10 = vld [vmem:[#allocation7 + $0x18] sm:$0xff]   ;;  %v567_v11 = vld [vmem:[#allocation5 + $0x30] sm:$0xff]   ;;  %p678_p5 = scmp.lt.s32.totalorder %s428_s29, %s428_s29 }
  0x4d   :  { %494 = vmatprep.subr.bf16.mxu0 %v709_v0  ;;  %514 = vmatprep.subr.bf16.mxu1 %v709_v0  ;;  %v573_v12 = vld [vmem:[#allocation7 + $0x20] sm:$0xff]   ;;  %v568_v13 = vld [vmem:[#allocation5 + $0x38] sm:$0xff]   ;;  %v574_v15 = vld [vmem:[#allocation7 + $0x28] sm:$0xff]  }
  0x4e   :  { %v81_v14 = vld [vmem:[#allocation2] sm:$0xff]  ;;  %v575_v17 = vld [vmem:[#allocation7 + $0x30] sm:$0xff]   ;;  %v577_v19 = vld [vmem:[#allocation8] sm:$0xff]  }
  0x4f   :  { %v99_v16 = vpack.c.bf16 %v81_v14, %v81_v14  ;;  %v576_v18 = vld [vmem:[#allocation7 + $0x38] sm:$0xff]   ;;  %v578_v20 = vld [vmem:[#allocation8 + $0x8] sm:$0xff]   ;;  %v579_v21 = vld [vmem:[#allocation8 + $0x10] sm:$0xff]  }
  0x50   :  { %495 = vmatpush3.bf16.msra.mxu0 %v562_v2  ;;  %515 = vmatpush3.bf16.msra.mxu1 %v570_v6  ;;  %v580_v22 = vld [vmem:[#allocation8 + $0x18] sm:$0xff]   ;;  %v581_v23 = vld [vmem:[#allocation8 + $0x20] sm:$0xff]   ;;  %v582_v24 = vld [vmem:[#allocation8 + $0x28] sm:$0xff]  }
  0x51   :  { %496 = vmatprep.subr.bf16.mxu0 %v709_v0  ;;  %516 = vmatprep.subr.bf16.mxu1 %v709_v0  ;;  %v438_v25 = vld [vmem:[%s862_s2] ss:$0 sm:$0xff]  ;;  %v583_v33 = vld [vmem:[#allocation8 + $0x30] sm:$0xff]  }
  0x52   :  { %v584_v34 = vld [vmem:[#allocation8 + $0x38] sm:$0xff]  }
  0x53   :  { %v447_v35 = vld [vmem:[%s864_s4] ss:$0 sm:$0xff]  ;;  %s673_s4 = scalar_lea.vmem %s428_s29, 128 }
  0x54   :  { %497 = vmatpush3.bf16.msra.mxu0 %v563_v3  ;;  %517 = vmatpush3.bf16.msra.mxu1 %v571_v8  ;;  %v456_v43 = vld [vmem:[%s866_s6] ss:$0 sm:$0xff]  ;;  %p674_p4 = scmp.ne.s32.totalorder %s428_s29, %s673_s4  ;;  %p679_p6 = scmp.lt.s32.totalorder %s673_s4, %s673_s4 }
  0x55   :  { %498 = vmatprep.subr.bf16.mxu0 %v709_v0  ;;  %518 = vmatprep.subr.bf16.mxu1 %v709_v0 }
  0x56   :  { %p680_p7 = por %p679_p6, %p678_p5 }
  0x58   :  { %499 = vmatpush3.bf16.msra.mxu0 %v564_v5  ;;  %519 = vmatpush3.bf16.msra.mxu1 %v572_v10  ;;  %p681_p8 = pnand %p680_p7, %p674_p4 }
  0x59   :  { %500 = vmatprep.subr.bf16.mxu0 %v709_v0  ;;  %520 = vmatprep.subr.bf16.mxu1 %v709_v0 }
  0x5c   :  { %501 = vmatpush3.bf16.msra.mxu0 %v565_v7  ;;  %521 = vmatpush3.bf16.msra.mxu1 %v573_v12 }
  0x5d   :  { %502 = vmatprep.subr.bf16.mxu0 %v709_v0  ;;  %522 = vmatprep.subr.bf16.mxu1 %v709_v0 }
  0x60   :  { %503 = vmatpush3.bf16.msra.mxu0 %v566_v9  ;;  %523 = vmatpush3.bf16.msra.mxu1 %v574_v15 }
  0x61   :  { %504 = vmatprep.subr.bf16.mxu0 %v709_v0  ;;  %524 = vmatprep.subr.bf16.mxu1 %v709_v0 }
  0x64   :  { %505 = vmatpush3.bf16.msra.mxu0 %v567_v11  ;;  %525 = vmatpush3.bf16.msra.mxu1 %v575_v17 }
  0x65   :  { %506 = vmatprep.subr.bf16.mxu0 %v709_v0  ;;  %526 = vmatprep.subr.bf16.mxu1 %v709_v0 }
  0x68   :  { %507 = vmatpush3.bf16.msra.mxu0 %v568_v13  ;;  %527 = vmatpush3.bf16.msra.mxu1 %v576_v18 }
  0x69   :  { %532 = vmatprep.subr.bf16.mxu0 %v709_v0 }
  0x6b   :  { %509 = vmatmul.mubr.bf16.vlgmr.msra.gmra.mrb[0].mxu0 %v99_v16 }
  0x6c   :  { %548 = vmatprep.mubr.msk.bf16.mxu0 %vm710_vm0, %v709_v0  ;;  %533 = vmatpush3.bf16.msra.mxu0 %v577_v19 }
  0x6d   :  { %534 = vmatprep.subr.bf16.mxu0 %v709_v0 }
  0x70   :  { %535 = vmatpush3.bf16.msra.mxu0 %v578_v20 }
  0x71   :  { %536 = vmatprep.subr.bf16.mxu0 %v709_v0 }
  0x74   :  { %537 = vmatpush3.bf16.msra.mxu0 %v579_v21 }
  0x75   :  { %538 = vmatprep.subr.bf16.mxu0 %v709_v0 }
  0x78   :  { %539 = vmatpush3.bf16.msra.mxu0 %v580_v22 }
  0x79   :  { %540 = vmatprep.subr.bf16.mxu0 %v709_v0 }
  0x7c   :  { %541 = vmatpush3.bf16.msra.mxu0 %v581_v23 }
  0x7d   :  { %542 = vmatprep.subr.bf16.mxu0 %v709_v0 }
  0x80   :  { %543 = vmatpush3.bf16.msra.mxu0 %v582_v24 }
  0x81   :  { %544 = vmatprep.subr.bf16.mxu0 %v709_v0 }
  0x84   :  { %545 = vmatpush3.bf16.msra.mxu0 %v583_v33 }
  0x85   :  { %546 = vmatprep.subr.bf16.mxu0 %v709_v0 }
  0x88   :  { %547 = vmatpush3.bf16.msra.mxu0 %v584_v34 }
 0x13e   :  { %v188_v26 = vpop.f32.mrb[0].mxu0 }
 0x13f   :  { %v189_v27 = vadd.f32 %v438_v25, %v188_v26  ;;  %v510_v28 = vpop.f32.mrb[1].mxu0 }
 0x140   :  { %v191_v29 = vpop.f32.mrb[2].mxu0 }
 0x141   :  { %v194_v30 = vmax.f32 %v189_v27, 0.0  ;;  %v511_v31 = vpop.f32.mrb[3].mxu0 }
 0x143   :  { %v212_v32 = vpack.c.bf16 %v194_v30, %v194_v30 }
 0x145   :  { %529 = vmatmul.mubr.bf16.vlgmr.msra.gmra.mrb[0].mxu1 %v212_v32 }
 0x218   :  { %v301_v36 = vpop.f32.mrb[0].mxu1 }
 0x219   :  { %v302_v37 = vadd.f32 %v447_v35, %v301_v36  ;;  %v530_v38 = vpop.f32.mrb[1].mxu1 }
 0x21a   :  { %v304_v39 = vpop.f32.mrb[2].mxu1 }
 0x21b   :  { %v307_v40 = vmax.f32 %v302_v37, 0.0  ;;  %v531_v41 = vpop.f32.mrb[3].mxu1 }
 0x21d   :  { %v325_v42 = vpack.c.bf16 %v307_v40, %v307_v40 }
 0x21f   :  { %549 = vmatmul.mubr.bf16.vlgmr.msra.gmra.mrb[4].mxu0 %v325_v42 }
 0x2f2   :  { %v414_v44 = vpop.f32.mrb[4].mxu0 }
 0x2f3   :  { %v415_v45 = vadd.f32 %v456_v43, %v414_v44  ;;  %v550_v46 = vpop.f32.mrb[5].mxu0 }
 0x2f4   :  { %v417_v47 = vpop.f32.mrb[6].mxu0 }
 0x2f5   :  { %420 = vst [vmem:[#allocation10] sm:$0xff] %v415_v45  ;;  %v551_v48 = vpop.f32.mrb[7].mxu0 }
 0x2f6   :  { %684 = shalt.err (!%p681_p8)
}
 0x2f7   :  { %s685_s6 = scalar_lea.hbm %s867_s7, 128 }
 0x2f8   :  { %p686_p9 = scmp.ne.s32.totalorder %s867_s7, %s685_s6  ;;  %p689_p10 = scmp.lt.u32.totalorder %s685_s6, %s867_s7 }
 0x2fa   :  { %p691_p11 = pnand %p689_p10, %p686_p9 }
 0x2fc   :  { %694 = shalt.err (!%p691_p11)
}
 0x2fd   :  { %430 = dma.vmem_to_hbm [thread:$0]  %s428_s29, 128, %s867_s7, [#allocation4]  }
 0x2fe   :  { %701 = dma.done.wait [#allocation4], 128  }
 0x2ff   :  { %702 = vsyncadd [#allocation4], 4294967168 }
 0x300   :  { %434 = vsyncpa [#allocation3], 1 }
 0x301   :  { %435 = vsyncpa [#allocation6], 1 }
 0x302   :  { %436 = vsyncpa [#allocation9], 1 }
 0x303   :  { %437 = vsyncpa [#allocation4], 1 }

</bundles_post_ra>
